<compile_context>
chip_gen: v7x
topology: tpu7x:2x2x1
jax: 0.10.0
libtpu: 0.0.40
codegen_flags: <defaults>
</compile_context>

<pallas_src>
import jax
import jax.numpy as jnp
from jax import lax
from jax.experimental import pallas as pl
from jax.experimental.pallas import tpu as pltpu


# ----------------------------------------------------------------------------- kernels

def _normalize_rows(y):
    # F.normalize(p=2, dim=1, eps=1e-12) == y / max(||y||_2, 1e-12).
    # Clamp the squared norm so a single EUP rsqrt replaces sqrt + divide.
    sumsq = jnp.sum(y * y, axis=1, keepdims=True)
    return y * lax.rsqrt(jnp.maximum(sumsq, 1e-24))


def _encoder_kernel_resident(x_ref, w_ref, b_ref, o_ref):
    """One batch tile, weight fully resident.

    x_ref : (block_b, F_in)  backbone features (f32)
    w_ref : (E, F_in)        Linear weight, PyTorch layout, grid-invariant
    b_ref : (1, E)           Linear bias (f32), grid-invariant
    o_ref : (block_b, E)     normalized embeddings
    """
    x = jnp.maximum(x_ref[...], 0.0)                         # ReLU (VPU)
    y = lax.dot_general(                                     # x @ W^T, NT contraction (MXU)
        x.astype(w_ref.dtype), w_ref[...],
        dimension_numbers=(((1,), (1,)), ((), ())),
        preferred_element_type=jnp.float32,
    )
    y = y + b_ref[...]                                       # (1, E) broadcast
    o_ref[...] = _normalize_rows(y).astype(o_ref.dtype)


def _encoder_kernel_ktiled(x_ref, w_ref, b_ref, o_ref, acc_ref):
    """K-tiled fallback: weight streamed in (E, block_k) tiles, f32 accumulator."""
    k = pl.program_id(1)

    @pl.when(k == 0)
    def _():
        acc_ref[...] = jnp.zeros_like(acc_ref)

    x = jnp.maximum(x_ref[...], 0.0)                         # ReLU is elementwise -> per K-tile is fine
    acc_ref[...] += lax.dot_general(
        x.astype(w_ref.dtype), w_ref[...],
        dimension_numbers=(((1,), (1,)), ((), ())),
        preferred_element_type=jnp.float32,
    )

    @pl.when(k == pl.num_programs(1) - 1)
    def _():
        y = acc_ref[...] + b_ref[...]
        o_ref[...] = _normalize_rows(y).astype(o_ref.dtype)


# ----------------------------------------------------------------------------- wrapper

def _invariant_spec(block_shape, index_map):
    """BlockSpec for a grid-invariant operand: single-buffered (no 2nd copy)."""
    try:
        return pl.BlockSpec(block_shape, index_map, pipeline_mode=pl.Buffered(1))
    except TypeError:  # older jax without pipeline_mode kwarg
        return pl.BlockSpec(block_shape, index_map)


def image_encoder_forward(features, weight, bias, *, block_b=256, block_k=None,
                          matmul_dtype=jnp.bfloat16, force_k_tiled=False):
    """ReLU -> Linear(W, b) -> L2-normalize, fused.

    features : (B, F_in) f32   backbone output
    weight   : (E, F_in) f32   PyTorch nn.Linear layout
    bias     : (E,) or (1, E) f32
    """
    B, F_in = features.shape
    E, F_in_w = weight.shape
    assert F_in == F_in_w
    bias2d = jnp.asarray(bias, jnp.float32).reshape(1, E)
    w = weight.astype(matmul_dtype)

    # ---- batch tile: big enough to fill the MXU, small enough to fit VMEM,
    # ---- and split so the 'parallel' grid has >= 2 steps (v7x megacore).
    block_b = min(block_b, B)
    if (B // block_b < 2 and block_b % 2 == 0
            and B % (block_b // 2) == 0 and block_b // 2 >= 8):
        block_b //= 2
    assert B % block_b == 0, "pad the batch to a multiple of block_b"
    grid_b = B // block_b

    itemsize = jnp.dtype(matmul_dtype).itemsize
    weight_bytes = E * F_in * itemsize
    resident_budget = 24 * 1024 * 1024  # safe on v5e/v6e (128 MiB) and v7x (64 MiB/TC)
    use_resident = (not force_k_tiled) and weight_bytes <= resident_budget

    if use_resident:
        grid = (grid_b,)
        in_specs = [
            pl.BlockSpec((block_b, F_in), lambda i: (i, 0)),          # feature rows
            _invariant_spec((E, F_in), lambda i: (0, 0)),             # weight, resident, 1 buffer
            _invariant_spec((1, E), lambda i: (0, 0)),                # bias, resident, 1 buffer
        ]
        out_specs = pl.BlockSpec((block_b, E), lambda i: (i, 0))      # lane-dense output
        kernel = _encoder_kernel_resident
        scratch = []
        dim_sem = ("parallel",)
        vmem_need = (weight_bytes + E * 4
                     + 2 * block_b * F_in * 4        # double-buffered x tiles
                     + 2 * block_b * E * 4           # double-buffered out tiles
                     + 2 * block_b * E * 4)          # y temporaries
    else:
        if block_k is None:
            for cand in (2048, 1024, 512, 256, 128):
                if F_in % cand == 0:
                    block_k = cand
                    break
            else:
                block_k = F_in
        assert F_in % block_k == 0, "pad F_in to a multiple of block_k"
        grid = (grid_b, F_in // block_k)
        in_specs = [
            pl.BlockSpec((block_b, block_k), lambda i, k: (i, k)),    # x K-tiles
            pl.BlockSpec((E, block_k), lambda i, k: (0, k)),          # streamed weight K-tiles
            _invariant_spec((1, E), lambda i, k: (0, 0)),             # bias, resident
        ]
        out_specs = pl.BlockSpec((block_b, E), lambda i, k: (i, 0))   # resident across k
        kernel = _encoder_kernel_ktiled
        scratch = [pltpu.VMEM((block_b, E), jnp.float32)]             # f32 accumulator
        dim_sem = ("parallel", "arbitrary")
        vmem_need = (2 * block_b * block_k * 4
                     + 2 * E * block_k * itemsize
                     + E * 4
                     + block_b * E * 4
                     + 2 * block_b * E * 4)

    vmem_limit = int(min(max(vmem_need + (8 << 20), 32 << 20), 96 << 20))

    out = pl.pallas_call(
        kernel,
        out_shape=jax.ShapeDtypeStruct((B, E), jnp.float32),
        grid=grid,
        in_specs=in_specs,
        out_specs=out_specs,
        scratch_shapes=scratch,
        compiler_params=pltpu.CompilerParams(
            dimension_semantics=dim_sem,
            vmem_limit_bytes=vmem_limit,
        ),
    )(features, w, bias2d)
    return out


# ----------------------------------------------------------------------------- reference

def _reference_forward(features, weight, bias2d):
    """Pure-JAX reference mirroring the PyTorch forward (post backbone)."""
    f = jnp.maximum(features, 0.0)
    y = jnp.dot(f, weight.T, precision=lax.Precision.HIGHEST) + bias2d
    n = jnp.linalg.norm(y, axis=1, keepdims=True)
    return y / jnp.maximum(n, 1e-12)


if __name__ == "__main__":
    # Small shapes consistent with the module: B pooled feature vectors of width
    # F_IN (the backbone's fc/classifier output), projected to EMBED and normalized.
    B, F_IN, EMBED = 16, 256, 128

    key = jax.random.PRNGKey(0)
    k_feat, k_w = jax.random.split(key)

    features = jax.random.normal(k_feat, (B, F_IN), dtype=jnp.float32)

    # Deterministic Linear params matching the PyTorch init:
    #   r = sqrt(6) / sqrt(in + out); weight ~ U(-r, r); bias = 0
    r = (6.0 / (F_IN + EMBED)) ** 0.5
    weight = jax.random.uniform(
        k_w, (EMBED, F_IN), minval=-r, maxval=r, dtype=jnp.float32
    )
    bias = jnp.zeros((EMBED,), dtype=jnp.float32)

    ref = _reference_forward(features, weight, bias.reshape(1, EMBED))

    # 1) Exact f32 path (resident-weight kernel).
    out_f32 = jax.block_until_ready(
        image_encoder_forward(features, weight, bias, matmul_dtype=jnp.float32)
    )
    assert out_f32.shape == (B, EMBED)
    assert jnp.allclose(out_f32, ref, atol=1e-4, rtol=1e-4), (
        float(jnp.max(jnp.abs(out_f32 - ref)))
    )

    # 2) Default fast path: bf16 MXU operands, f32 accumulate / bias / normalize.
    out_bf16 = jax.block_until_ready(image_encoder_forward(features, weight, bias))
    assert jnp.allclose(out_bf16, ref, atol=3e-2, rtol=3e-2), (
        float(jnp.max(jnp.abs(out_bf16 - ref)))
    )

    # 3) K-tiled fallback path (used automatically when the weight is too big to
    #    stay resident); exercised here at f32 with block_k=128.
    out_kt = jax.block_until_ready(
        image_encoder_forward(features, weight, bias,
                              matmul_dtype=jnp.float32,
                              force_k_tiled=True, block_k=128)
    )
    assert jnp.allclose(out_kt, ref, atol=1e-4, rtol=1e-4), (
        float(jnp.max(jnp.abs(out_kt - ref)))
    )

    print("KERNEL_OK")
</pallas_src>

<mosaic_0001>
module attributes {stable_mosaic.version = 11 : i64} {
  func.func @_encoder_kernel_resident(%arg0: i32, %arg1: memref<8x256xf32, #tpu.memory_space<vmem>>, %arg2: memref<128x256xf32, #tpu.memory_space<vmem>>, %arg3: memref<1x128xf32, #tpu.memory_space<vmem>>, %arg4: memref<8x128xf32, #tpu.memory_space<vmem>>) attributes {dimension_semantics = [#tpu.dimension_semantics<parallel>], iteration_bounds = array<i64: 2>, scalar_prefetch = 0 : i64, scratch_operands = 0 : i64, tpu.core_type = #tpu.core_type<tc>, window_params = [{transform_indices = @transform_0, window_bounds = array<i64: 8, 256>}, {pipeline_mode = #tpu.pipeline_mode<synchronous>, transform_indices = @transform_1, window_bounds = array<i64: 128, 256>}, {pipeline_mode = #tpu.pipeline_mode<synchronous>, transform_indices = @transform_2, window_bounds = array<i64: 1, 128>}, {transform_indices = @transform_3, window_bounds = array<i64: 8, 128>}]} {
    %c0 = arith.constant 0 : index
    %c0_0 = arith.constant 0 : index
    %0 = vector.load %arg1[%c0, %c0_0] : memref<8x256xf32, #tpu.memory_space<vmem>>, vector<8x256xf32>
    %cst = arith.constant 0.000000e+00 : f32
    %1 = vector.broadcast %cst : f32 to vector<8x256xf32>
    %2 = arith.maximumf %0, %1 : vector<8x256xf32>
    %c0_1 = arith.constant 0 : index
    %c0_2 = arith.constant 0 : index
    %3 = vector.load %arg2[%c0_1, %c0_2] : memref<128x256xf32, #tpu.memory_space<vmem>>, vector<128x256xf32>
    %cst_3 = arith.constant dense<0.000000e+00> : vector<8x128xf32>
    %4 = tpu.matmul %2, %3, %cst_3 {dimension_numbers = #tpu.dot_dimension_numbers<[1], [1], [0], [0], [0, 0, 1, 0], [], []>} : vector<8x256xf32>, vector<128x256xf32>, vector<8x128xf32> -> vector<8x128xf32>
    %c0_4 = arith.constant 0 : index
    %c0_5 = arith.constant 0 : index
    %5 = vector.load %arg3[%c0_4, %c0_5] : memref<1x128xf32, #tpu.memory_space<vmem>>, vector<1x128xf32>
    %6 = vector.broadcast %5 : vector<1x128xf32> to vector<8x128xf32>
    %7 = arith.addf %4, %6 : vector<8x128xf32>
    %8 = arith.mulf %7, %7 : vector<8x128xf32>
    %cst_6 = arith.constant dense<0.000000e+00> : vector<8xf32>
    %9 = vector.multi_reduction <add>, %8, %cst_6 [1] : vector<8x128xf32> to vector<8xf32>
    %10 = vector.shape_cast %9 : vector<8xf32> to vector<8x1xf32>
    %cst_7 = arith.constant 1.000000e-24 : f32
    %11 = vector.broadcast %cst_7 : f32 to vector<8x1xf32>
    %12 = arith.maximumf %10, %11 : vector<8x1xf32>
    %13 = math.rsqrt %12 : vector<8x1xf32>
    %14 = vector.broadcast %13 : vector<8x1xf32> to vector<8x128xf32>
    %15 = arith.mulf %7, %14 : vector<8x128xf32>
    %c0_8 = arith.constant 0 : index
    %c0_9 = arith.constant 0 : index
    %16 = vector.load %arg4[%c0_8, %c0_9] : memref<8x128xf32, #tpu.memory_space<vmem>>, vector<8x128xf32>
    tpu.vector_store %arg4[%c0_8, %c0_9], %15 {strides = array<i32>} : memref<8x128xf32, #tpu.memory_space<vmem>>, vector<8x128xf32>,
    return
  }
  func.func @transform_0(%arg0: i32) -> (i32, i32) {
    %c0_i32 = arith.constant 0 : i32
    %c0_i32_0 = arith.constant 0 : i32
    return %arg0, %c0_i32 : i32, i32
  }
  func.func @transform_1(%arg0: i32) -> (i32, i32) {
    %c0_i32 = arith.constant 0 : i32
    %c0_i32_0 = arith.constant 0 : i32
    %c0_i32_1 = arith.constant 0 : i32
    return %c0_i32, %c0_i32_0 : i32, i32
  }
  func.func @transform_2(%arg0: i32) -> (i32, i32) {
    %c0_i32 = arith.constant 0 : i32
    %c0_i32_0 = arith.constant 0 : i32
    %c0_i32_1 = arith.constant 0 : i32
    return %c0_i32, %c0_i32_0 : i32, i32
  }
  func.func @transform_3(%arg0: i32) -> (i32, i32) {
    %c0_i32 = arith.constant 0 : i32
    %c0_i32_0 = arith.constant 0 : i32
    return %arg0, %c0_i32 : i32, i32
  }
}

</mosaic_0001>

<bundles_post_ra>
// kernel: tpu_custom_call.1
= control target key start
LH: loop header
LB: loop body
LE: loop exit
PB: predicated region body
PF: predicated region fallthrough
CT: control target
= control target key end

     0   :  { %8 = vsyncpa [#allocation3], 0  ;;  %s885_s0 = inlined_call_operand.hbm [shape: f32[16,256], index: 0, kind: input, shape index: {}]   ;;  %s886_s1 = inlined_call_operand.hbm [shape: f32[128,256], index: 1, kind: input, shape index: {}]   ;;  %s887_s2 = inlined_call_operand.vmem [shape: f32[1,128], index: 2, kind: input, shape index: {}]   ;;  %s888_s3 = inlined_call_operand.hbm [shape: f32[16,128], index: 3, kind: output, shape index: {}]  }
   0x1   :  { %10 = vsyncpa [#allocation3 + $0x1], 0 }
   0x2   :  { %11 = vsyncpa [#allocation6], 0 }
   0x3   :  { %12 = vsyncpa [#allocation4], 0 }
   0x4   :  { %14 = vsyncpa [#allocation4 + $0x1], 0  ;;  %s681_s12 = smov 0   ;;  %s683_s13 = smov 0  }
   0x5   :  { %s685_s14 = smov 0   ;;  %s687_s15 = smov 0  }
   0x6 LB: > { %s702_s16 = sadd.s32 4294967295, %s654_s15   ;;  %s416_s17 = sadd.s32 4294967294, %s654_s15   ;;  %s654_s15 = sphi %s687_s15, %s908_s15   ;;  %s650_s14 = sphi %s685_s14, %s907_s14   ;;  %s646_s13 = sphi %s683_s13, %s906_s13   ;;  %s642_s12 = sphi %s681_s12, %s905_s12  }
   0x7   : > { %p40_p0 = scmp.ne.s32.totalorder %s646_s13, %s642_s12  ;;  %p889_p1 = scmp.eq.s32.totalorder %s702_s16, 0 }
   0x8   : > { %p112_p3 = scmp.eq.s32.totalorder %s416_s17, 1  ;;  %p417_p5 = scmp.ge.s32.totalorder %s654_s15, 1 }
   0x9   : > { %p711_p4 = por %p889_p1, %p40_p0  ;;  %p119_p7 = scmp.lt.s32.totalorder %s654_s15, 3 }
   0xa   : > { %p716_p6 = por %p112_p3, %p40_p0  ;;  %s656_s21 = smov [#allocation5]  }
   0xb   : > { %s892_s18 = scalar_select %p711_p4, 1, 0 }
   0xc   : > { %s893_s19 = scalar_select %p716_p6, 1, 0 }
   0xd   : > { %p721_p8 = pnand %p417_p5, %p119_p7  ;;  %s131_s22 = sshll.u32 %s656_s21, 4  ;;  %s725_s22 = int_to_ptr.vmem [resolvable:$true] %s131_s22 }
   0xe   : > { %s737_s24 = sadd.s32 1, %s654_s15   ;;  %s27_s25 = sadd.s32 1, %s650_s14 }
   0xf   : > { %s894_s20 = scalar_select %p721_p8, 1, 0 }
  0x10   : > { %p473_p9 = pneg %p721_p8  ;;  %s24_s26 = ssub.s32 %s654_s15, %s737_s24 }
  0x11   : > { %s526_s29 = scalar_lea.hbm %s886_s1, 4096 }
  0x12   : > { %p732_p11 = pnand %p473_p9, %p889_p1  ;;  %p527_p12 = scmp.ne.s32.totalorder %s886_s1, %s526_s29 }
  0x13   : > { %p533_p5 = scmp.lt.u32.totalorder %s526_s29, %s886_s1 }
  0x14   : > { %p528_p13 = pneg %p732_p11 }
  0x16   : > { %p529_p0 = pnand %p528_p13, %p527_p12 }
  0x18   : > { %p530_p3 = pneg %p529_p0 }
  0x1a   : > { %p535_p7 = pnand %p533_p5, %p530_p3 }
  0x1c   : > { %538 = shalt.err (!%p535_p7)
}
  0x1d   : > { %s539_s7 = scalar_lea.vmem %s725_s22, 4096  ;;  %p547_p2 = scmp.lt.s32.totalorder %s725_s22, %s725_s22 }
  0x1e   : > { %p540_p9 = scmp.ne.s32.totalorder %s725_s22, %s539_s7  ;;  %p548_p6 = scmp.lt.s32.totalorder %s539_s7, %s539_s7 }
  0x20   : > { %p542_p10 = pnand %p540_p9, %p528_p13  ;;  %p549_p4 = por %p548_p6, %p547_p2 }
  0x22   : > { %p543_p1 = pneg %p542_p10 }
  0x24   : > { %p550_p8 = pnand %p549_p4, %p543_p1 }
  0x26   : > { %553 = shalt.err (!%p550_p8)
}
  0x27   : > { %s657_s8 = smov 256   ;;  %s658_s9 = smov 16  }
  0x28   : > { %476 = dma.hbm_to_vmem [thread:$0]  (!%p732_p11), %s886_s1, 4096, %s725_s22, [#allocation6], %s657_s8, %s657_s8, %s658_s9  }
  0x29   : > { %p25_p2 = scmp.eq.s32.totalorder %s24_s26, 0  ;;  %p34_p1 = scmp.ne.s32.totalorder %s650_s14, %s646_s13 }
  0x2a   : > { %p35_p4 = scmp.eq.s32.totalorder %s654_s15, 0  ;;  %p486_p6 = scmp.lt.s32.totalorder %s654_s15, 2 }
  0x2b   : > { %s768_s17 = scalar_select %p25_p2, %s650_s14, %s27_s25  }
  0x2c   : > { %p36_p8 = por %p35_p4, %p34_p1  ;;  %p896_p10 = scmp.eq.s32.totalorder %s702_s16, 1 }
  0x2d   : > { %s148_s27 = sand.u32 1, %s650_s14   ;;  %s432_s28 = sshll.u32 %s654_s15, 8 }
  0x2e   : > { %p772_p12 = por %p896_p10, %p34_p1  ;;  %s420_s29 = sshll.u32 %s148_s27, 4 }
  0x2f   : > { %s781_s4 = scalar_lea.hbm %s885_s0, %s432_s28  ;;  %s152_s22 = scalar_lea.vmem [#allocation2], %s420_s29 }
  0x30   : > { %s160_s25 = sshll.u32 %s152_s22, 4  ;;  %p783_p11 = pnand %p486_p6, %p36_p8  ;;  %s787_s25 = int_to_ptr.vmem [resolvable:$true] %s160_s25 }
  0x31   : > { %s149_s5 = scalar_lea.sflag [#allocation3], %s148_s27  ;;  %s554_s6 = scalar_lea.hbm %s781_s4, 256 }
  0x32   : > { %p555_p13 = scmp.ne.s32.totalorder %s781_s4, %s554_s6  ;;  %p556_p0 = pneg %p783_p11 }
  0x33   : > { %s559_s9 = scalar_lea.hbm %s885_s0, 512  ;;  %p560_p7 = scmp.lt.u32.totalorder %s781_s4, %s885_s0 }
  0x34   : > { %p557_p3 = pnand %p556_p0, %p555_p13  ;;  %p561_p9 = scmp.lt.u32.totalorder %s559_s9, %s554_s6 }
  0x35   : > { %p563_p1 = scmp.lt.u32.totalorder %s554_s6, %s781_s4 }
  0x36   : > { %p558_p5 = pneg %p557_p3  ;;  %p562_p2 = por %p561_p9, %p560_p7 }
  0x38   : > { %p564_p4 = por %p563_p1, %p562_p2 }
  0x3a   : > { %p565_p6 = pnand %p564_p4, %p558_p5 }
  0x3c   : > { %568 = shalt.err (!%p565_p6)
}
  0x3d   : > { %s569_s27 = scalar_lea.vmem %s787_s25, 256  ;;  %s659_s28 = smov [#allocation2]  }
  0x3e   : > { %p570_p8 = scmp.ne.s32.totalorder %s787_s25, %s569_s27  ;;  %s574_s29 = sshll.u32 %s659_s28, 4  ;;  %s575_s29 = int_to_ptr.vmem [resolvable:$false] %s574_s29 }
  0x3f   : > { %s576_s23 = scalar_lea.vmem %s575_s29, 512  ;;  %p577_p3 = scmp.lt.s32.totalorder %s787_s25, %s575_s29 }
  0x40   : > { %p572_p10 = pnand %p570_p8, %p556_p0  ;;  %p578_p7 = scmp.lt.s32.totalorder %s576_s23, %s569_s27 }
  0x42   : > { %p573_p13 = pneg %p572_p10  ;;  %p579_p9 = por %p578_p7, %p577_p3 }
  0x44   : > { %p580_p2 = pnand %p579_p9, %p573_p13 }
  0x46   : > { %583 = shalt.err (!%p580_p2)
}
  0x47   : > { %480 = dma.hbm_to_vmem [thread:$0]  (!%p783_p11), %s781_s4, 256, %s787_s25, %s149_s5  }
  0x48   : > { %p899_p5 = scmp.ne.s32.totalorder %s894_s20, 0 }
  0x49   : > { %s817_s30 = sand.u32 (!%p899_p5), 1, %s646_s13   ;;  %p900_p0 = scmp.ne.s32.totalorder (!%p899_p5), %s892_s18, 0 }
  0x4a   : > { %169 = sbr.rel (%p899_p5) target bundleno = 539 (0x21b), region = 32  ;;  %s424_s22 = sshll.u32 (!%p899_p5), %s817_s30, 4 }
  0x4b   : > { %s172_s6 = scalar_lea.sflag (!%p899_p5), [#allocation3], %s817_s30  ;;  %s821_s7 = scalar_lea.vmem (!%p899_p5), [#allocation2], %s424_s22 }
  0x51   : > { %629 = dma.done.wait (%p900_p0), %s172_s6, 256  }
  0x52   : > { %631 = vsyncadd (%p900_p0), %s172_s6, 4294967040  ;;  %p901_p11 = scmp.eq.s32.totalorder %s702_s16, 0 }
  0x54   : > { %633 = dma.done.wait (%p901_p11), [#allocation6], 4096   ;;  %p902_p1 = pmov %p901_p11 }
  0x55   : > { %v207_v0 = vld [vmem:[#allocation5 + $0x8] sm:$0xff]  ;;  %v209_v1 = vld [vmem:[#allocation5 + $0x18] sm:$0xff]  ;;  %v206_v2 = vld [vmem:[#allocation5] sm:$0xff]  ;;  %s426_s4 = sshll.u32 %s817_s30, 3  ;;  %s429_s25 = sshll.u32 %s702_s16, 7 }
  0x56   : > { %635 = vsyncadd (%p902_p1), [#allocation6], 4294963200  ;;  %v433_v3 = vpack.c.bf16 %v209_v1, %v207_v0  ;;  %v208_v4 = vld [vmem:[#allocation5 + $0x10] sm:$0xff]  ;;  %v211_v5 = vld [vmem:[#allocation5 + $0x28] sm:$0xff]  ;;  %s201_s26 = scalar_lea.vmem [#allocation7], %s426_s4  ;;  %s841_s10 = scalar_lea.hbm %s888_s3, %s429_s25 }
  0x57   : > { %v213_v6 = vld [vmem:[#allocation5 + $0x38] sm:$0xff]  ;;  %v435_v7 = vpack.c.bf16 %v208_v4, %v206_v2  ;;  %v210_v9 = vld [vmem:[#allocation5 + $0x20] sm:$0xff]  ;;  %v212_v10 = vld [vmem:[#allocation5 + $0x30] sm:$0xff]  ;;  %s336_s5 = sshll.u32 %s201_s26, 4  ;;  %s323_s11 = scalar_lea.sflag [#allocation4], %s817_s30  ;;  %s843_s5 = int_to_ptr.vmem [resolvable:$true] %s336_s5 }
  0x58   : > { %v437_v8 = vpack.c.bf16 %v213_v6, %v211_v5  ;;  %434 = vmatprep.subr.bf16.mxu0 %v433_v3  ;;  %v215_v11 = vld [vmem:[#allocation5 + $0x48] sm:$0xff]  ;;  %v217_v12 = vld [vmem:[#allocation5 + $0x58] sm:$0xff]  ;;  %v439_v13 = vpack.c.bf16 %v212_v10, %v210_v9  ;;  %v214_v17 = vld [vmem:[#allocation5 + $0x40] sm:$0xff]  ;;  %s584_s27 = scalar_lea.vmem %s843_s5, 128  ;;  %s660_s16 = smov [#allocation7]  }
  0x59   : > { %436 = vmatpush1.bf16.xpose.msra.mxu0 %v435_v7  ;;  %v441_v14 = vpack.c.bf16 %v217_v12, %v215_v11  ;;  %v203_v15 = vld [vmem:[%s821_s7 + $0x8] sm:$0xff]  ;;  %v216_v18 = vld [vmem:[#allocation5 + $0x50] sm:$0xff]  ;;  %v218_v23 = vld [vmem:[#allocation5 + $0x60] sm:$0xff]  ;;  %p585_p4 = scmp.ne.s32.totalorder %s843_s5, %s584_s27  ;;  %s588_s28 = sshll.u32 %s660_s16, 4  ;;  %s589_s28 = int_to_ptr.vmem [resolvable:$false] %s588_s28 }
  0x5a   : > { %438 = vmatprep.subr.bf16.mxu0 %v437_v8  ;;  %v205_v16 = vmax.f32 %v203_v15, 0.0  ;;  %v219_v19 = vld [vmem:[#allocation5 + $0x68] sm:$0xff]  ;;  %v221_v20 = vld [vmem:[#allocation5 + $0x78] sm:$0xff]  ;;  %v443_v21 = vpack.c.bf16 %v216_v18, %v214_v17  ;;  %v220_v24 = vld [vmem:[#allocation5 + $0x70] sm:$0xff]  ;;  %s590_s29 = scalar_lea.vmem %s589_s28, 256  ;;  %p591_p10 = scmp.lt.s32.totalorder %s843_s5, %s589_s28 }
  0x5b   : > { %v445_v22 = vpack.c.bf16 %v221_v20, %v219_v19  ;;  %v223_v25 = vld [vmem:[#allocation5 + $0x88] sm:$0xff]  ;;  %v225_v26 = vld [vmem:[#allocation5 + $0x98] sm:$0xff]  ;;  %v447_v27 = vpack.c.bf16 %v220_v24, %v218_v23  ;;  %v222_v29 = vld [vmem:[#allocation5 + $0x80] sm:$0xff]  ;;  %p586_p6 = pnand %p585_p4, %p772_p12  ;;  %p592_p13 = scmp.lt.s32.totalorder %s590_s29, %s584_s27 }
  0x5c   : > { %309 = vmatprep.mubr.f32.mxu0 %v205_v16  ;;  %v449_v28 = vpack.c.bf16 %v225_v26, %v223_v25  ;;  %v224_v30 = vld [vmem:[#allocation5 + $0x90] sm:$0xff]  ;;  %v227_v31 = vld [vmem:[#allocation5 + $0xa8] sm:$0xff]  ;;  %v229_v32 = vld [vmem:[#allocation5 + $0xb8] sm:$0xff] }
  0x5d   : > { %v451_v33 = vpack.c.bf16 %v224_v30, %v222_v29  ;;  %v453_v34 = vpack.c.bf16 %v229_v32, %v227_v31  ;;  %v226_v35 = vld [vmem:[#allocation5 + $0xa0] sm:$0xff]  ;;  %v228_v36 = vld [vmem:[#allocation5 + $0xb0] sm:$0xff]  ;;  %v231_v37 = vld [vmem:[#allocation5 + $0xc8] sm:$0xff]  ;;  %p587_p8 = pneg %p586_p6  ;;  %p593_p3 = por %p592_p13, %p591_p10 }
  0x5e   : > { %v233_v38 = vld [vmem:[#allocation5 + $0xd8] sm:$0xff]  ;;  %v455_v39 = vpack.c.bf16 %v228_v36, %v226_v35  ;;  %v230_v41 = vld [vmem:[#allocation5 + $0xc0] sm:$0xff]  ;;  %v232_v42 = vld [vmem:[#allocation5 + $0xd0] sm:$0xff] }
  0x5f   : > { %v457_v40 = vpack.c.bf16 %v233_v38, %v231_v37  ;;  %v235_v43 = vld [vmem:[#allocation5 + $0xe8] sm:$0xff]  ;;  %v237_v44 = vld [vmem:[#allocation5 + $0xf8] sm:$0xff]  ;;  %v459_v45 = vpack.c.bf16 %v232_v42, %v230_v41  ;;  %v234_v47 = vld [vmem:[#allocation5 + $0xe0] sm:$0xff]  ;;  %p594_p7 = pnand %p593_p3, %p587_p8 }
  0x60   : > { %v461_v46 = vpack.c.bf16 %v237_v44, %v235_v43  ;;  %v236_v48 = vld [vmem:[#allocation5 + $0xf0] sm:$0xff]  ;;  %v427_v52 = vld [vmem:[%s887_s2] ss:$0 sm:$0xff] }
  0x61   : > { %440 = vmatpush1.bf16.xpose.msra.mxu0 %v439_v13  ;;  %v463_v49 = vpack.c.bf16 %v236_v48, %v234_v47  ;;  %v202_v50 = vld [vmem:[%s821_s7] sm:$0xff] }
  0x62   : > { %442 = vmatprep.subr.bf16.mxu0 %v441_v14  ;;  %v204_v51 = vmax.f32 %v202_v50, 0.0 }
  0x69   : > { %444 = vmatpush1.bf16.xpose.msra.mxu0 %v443_v21 }
  0x6a   : > { %446 = vmatprep.subr.bf16.mxu0 %v445_v22 }
  0x71   : > { %448 = vmatpush1.bf16.xpose.msra.mxu0 %v447_v27 }
  0x72   : > { %450 = vmatprep.subr.bf16.mxu0 %v449_v28 }
  0x79   : > { %452 = vmatpush1.bf16.xpose.msra.mxu0 %v451_v33 }
  0x7a   : > { %454 = vmatprep.subr.bf16.mxu0 %v453_v34 }
  0x81   : > { %456 = vmatpush1.bf16.xpose.msra.mxu0 %v455_v39 }
  0x82   : > { %458 = vmatprep.subr.bf16.mxu0 %v457_v40 }
  0x89   : > { %460 = vmatpush1.bf16.xpose.msra.mxu0 %v459_v45 }
  0x8a   : > { %462 = vmatprep.subr.bf16.mxu0 %v461_v46 }
  0x91   : > { %464 = vmatpush1.bf16.xpose.msra.mxu0 %v463_v49 }
  0x98   : > { %310 = vmatmul.mubr.f32.vlgmr.msra.gmra.mrb[0].mxu0 %v204_v51 }
 0x16b   : > { %v311_v53 = vpop.f32.mrb[0].mxu0 }
 0x16c   : > { %v312_v54 = vadd.f32 %v427_v52, %v311_v53  ;;  %v313_v55 = vpop.f32.mrb[1].mxu0 }
 0x16e   : > { %v315_v56 = vmul.f32 %v312_v54, %v312_v54 }
 0x170   : > { %316 = vadd.xlane.f32.xlu0 %v315_v56 }
 0x1fd   : > { %v317_v57 = vpop.xlane.xlu0 %316 }
 0x1fe   : > { %v318_v58 = vmax.f32 %v317_v57, 1e-24 }
 0x200   : > { %524 = vrsqrt.f32 %v318_v58 }
 0x20a   : > { %v525_v59 = vpop.eup %524 }
 0x20b   : > { %v320_v60 = vmul.f32 %v525_v59, %v312_v54 }
 0x20d   : > { %321 = vst [vmem:[%s201_s26] sm:$0xff] %v320_v60 }
 0x20e   : > { %597 = shalt.err (!%p594_p7)
}
 0x20f   : > { %s598_s23 = scalar_lea.hbm %s841_s10, 128  ;;  %s602_s6 = scalar_lea.hbm %s888_s3, 256 }
 0x210   : > { %p599_p9 = scmp.ne.s32.totalorder %s841_s10, %s598_s23  ;;  %p603_p0 = scmp.lt.u32.totalorder %s841_s10, %s888_s3 }
 0x211   : > { %p604_p11 = scmp.lt.u32.totalorder %s602_s6, %s598_s23  ;;  %p606_p4 = scmp.lt.u32.totalorder %s598_s23, %s841_s10 }
 0x212   : > { %p600_p2 = pnand %p599_p9, %p772_p12 }
 0x213   : > { %p605_p1 = por %p604_p11, %p603_p0 }
 0x214   : > { %p601_p5 = pneg %p600_p2 }
 0x215   : > { %p607_p6 = por %p606_p4, %p605_p1 }
 0x217   : > { %p608_p8 = pnand %p607_p6, %p601_p5 }
 0x219   : > { %611 = shalt.err (!%p608_p8)
}
 0x21a   : > { %471 = dma.vmem_to_hbm [thread:$0]  (%p772_p12), %s843_s5, 128, %s841_s10, %s323_s11  }
 0x21b PF: > { %s348_s20 = sand.u32 1, %s642_s12   ;;  %p903_p10 = scmp.ne.s32.totalorder %s893_s19, 0 }
 0x21c   : > { %p904_p13 = scmp.ge.s32.totalorder %s654_s15, 2  ;;  %s349_s4 = scalar_lea.sflag [#allocation4], %s348_s20 }
 0x21e   : > { %p482_p3 = pnand %p904_p13, %p903_p10 }
 0x220   : > { %637 = dma.done.wait (!%p482_p3), %s349_s4, 128  }
 0x221   : > { %639 = vsyncadd (!%p482_p3), %s349_s4, 4294967168  ;;  %p17_p7 = scmp.ge.s32.totalorder %s737_s24, 4   ;;  %s905_s12 = smov %s646_s13 }
 0x222   : > { %s906_s13 = smov %s650_s14  ;;  %s907_s14 = smov %s768_s17 }
 0x223   : > { %s908_s15 = smov %s737_s24  ;;  %19 = sbr.rel (!%p17_p7) target bundleno = 6 (0x6), region = 81 }
 0x22a   :  { %354 = vsyncpa [#allocation3], 1 }
 0x22b   :  { %356 = vsyncpa [#allocation3 + $0x1], 1 }
 0x22c   :  { %357 = vsyncpa [#allocation6], 1 }
 0x22d   :  { %358 = vsyncpa [#allocation4], 1 }
 0x22e   :  { %360 = vsyncpa [#allocation4 + $0x1], 1 }

</bundles_post_ra>
